<compile_context>
chip_gen: v7x
topology: tpu7x:2x2x1
jax: 0.10.0
libtpu: 0.0.40
codegen_flags: <defaults>
</compile_context>

<pallas_src>
import jax
import jax.numpy as jnp
from jax.experimental import pallas as pl
from jax.experimental.pallas import tpu as pltpu

# torch.Tensor([0, 0, 0]) / torch.Tensor([1, 1, 1]) from the module's forward,
# folded as compile-time constants (all entries equal, so scalars suffice).
_SCALE = 0.0
_SHIFT = 1.0


def _round_up(n, m):
    return ((n + m - 1) // m) * m


def actor_kernel(x_ref, w1_ref, b1_ref, w2_ref, b2_ref, w3_ref, b3_ref, o_ref):
    # fc1 + ReLU
    h1 = jnp.dot(x_ref[...], w1_ref[...], preferred_element_type=jnp.float32)
    h1 = jnp.maximum(h1 + b1_ref[...], 0.0)
    # fc2 + ReLU
    h2 = jnp.dot(h1, w2_ref[...], preferred_element_type=jnp.float32)
    h2 = jnp.maximum(h2 + b2_ref[...], 0.0)
    # fc3 + sigmoid
    logits = jnp.dot(h2, w3_ref[...], preferred_element_type=jnp.float32)
    logits = logits + b3_ref[...]
    probs = jax.nn.sigmoid(logits)
    # out * [0,0,0] + [1,1,1]  (constants folded into the epilogue)
    o_ref[...] = probs * _SCALE + _SHIFT


def pack_actor_params(w1, b1, w2, b2, w3, b3):
    """Zero-pad logical params to TPU-friendly shapes.

    Weights are stored transposed vs. PyTorch, i.e. (in, out). Padding is
    zero-filled: ReLU(0)=0, so padded hidden columns contribute nothing and
    padded output columns are sliced away in the wrapper -> results exact.
    """
    K, H1 = w1.shape
    H2 = w2.shape[1]
    N = w3.shape[1]
    Kp = _round_up(K, 8)        # sublane-aligned contraction dim for fc1
    H1p = _round_up(H1, 128)    # lane-aligned hidden dims
    H2p = _round_up(H2, 128)
    Np = _round_up(N, 128)      # lane-dense output slab

    w1p = jnp.zeros((Kp, H1p), jnp.float32).at[:K, :H1].set(w1)
    b1p = jnp.zeros((1, H1p), jnp.float32).at[:, :H1].set(b1)
    w2p = jnp.zeros((H1p, H2p), jnp.float32).at[:H1, :H2].set(w2)
    b2p = jnp.zeros((1, H2p), jnp.float32).at[:, :H2].set(b2)
    w3p = jnp.zeros((H2p, Np), jnp.float32).at[:H2, :N].set(w3)
    b3p = jnp.zeros((1, Np), jnp.float32).at[:, :N].set(b3)
    return (w1p, b1p, w2p, b2p, w3p, b3p)


def actor_forward(x, packed_params, num_actions=3, *, block_b=256):
    """x: (B, state_size) float32. Returns (B, num_actions) float32."""
    w1, b1, w2, b2, w3, b3 = packed_params
    B, K = x.shape
    Kp = w1.shape[0]
    H1 = w1.shape[1]
    H2 = w2.shape[1]
    Np = w3.shape[1]

    # Batch tile: big enough to amortize per-step overhead, small enough that
    # f32 (bb, Kp) + (bb, Np) double-buffers stay far below even v7x's VMEM.
    bb = block_b if B >= block_b else _round_up(max(B, 1), 8)
    Bp = _round_up(B, bb)
    xp = jnp.zeros((Bp, Kp), jnp.float32).at[:B, :K].set(x.astype(jnp.float32))

    const = lambda i: (0, 0)  # weights/biases: DMA'd once, VMEM-resident
    out = pl.pallas_call(
        actor_kernel,
        out_shape=jax.ShapeDtypeStruct((Bp, Np), jnp.float32),
        grid=(Bp // bb,),
        in_specs=[
            pl.BlockSpec((bb, Kp), lambda i: (i, 0)),   # x: batch-tiled
            pl.BlockSpec((Kp, H1), const),              # w1
            pl.BlockSpec((1, H1), const),               # b1
            pl.BlockSpec((H1, H2), const),              # w2
            pl.BlockSpec((1, H2), const),               # b2
            pl.BlockSpec((H2, Np), const),              # w3
            pl.BlockSpec((1, Np), const),               # b3
        ],
        out_specs=pl.BlockSpec((bb, Np), lambda i: (i, 0)),
        compiler_params=pltpu.CompilerParams(
            dimension_semantics=("parallel",),          # v7x: 2 TCs share batch
        ),
    )(xp, w1, b1, w2, b2, w3, b3)
    return out[:B, :num_actions]


def init_actor_params(key, state_size=5, h1=50, h2=50, num_actions=3):
    """Xavier-uniform weights (as the torch module) + PyTorch-default biases.
    Weights stored as (in, out)."""
    def xavier(key, fan_in, fan_out):
        bound = jnp.sqrt(6.0 / (fan_in + fan_out))
        return jax.random.uniform(key, (fan_in, fan_out), jnp.float32,
                                  minval=-bound, maxval=bound)

    def bias(key, fan_in, fan_out):
        bound = 1.0 / jnp.sqrt(fan_in)
        return jax.random.uniform(key, (1, fan_out), jnp.float32,
                                  minval=-bound, maxval=bound)

    k1, k2, k3, k4, k5, k6 = jax.random.split(key, 6)
    w1 = xavier(k1, state_size, h1)
    b1 = bias(k2, state_size, h1)
    w2 = xavier(k3, h1, h2)
    b2 = bias(k4, h1, h2)
    w3 = xavier(k5, h2, num_actions)
    b3 = bias(k6, h2, num_actions)
    return (w1, b1, w2, b2, w3, b3)


def _reference(x, params):
    w1, b1, w2, b2, w3, b3 = params
    h1 = jnp.maximum(x @ w1 + b1, 0.0)
    h2 = jnp.maximum(h1 @ w2 + b2, 0.0)
    probs = jax.nn.sigmoid(h2 @ w3 + b3)
    return probs * jnp.array([0.0, 0.0, 0.0]) + jnp.array([1.0, 1.0, 1.0])


if __name__ == "__main__":
    key = jax.random.PRNGKey(0)
    k_param, k_x, k_x2 = jax.random.split(key, 3)

    state_size, h1, h2, num_actions = 5, 50, 50, 3
    params = init_actor_params(k_param, state_size, h1, h2, num_actions)
    packed = pack_actor_params(*params)

    # Small case (module-sized batch).
    x = jax.random.normal(k_x, (2, state_size), jnp.float32)
    out = jax.block_until_ready(actor_forward(x, packed, num_actions))
    ref = _reference(x, params)
    assert out.shape == (2, num_actions)
    assert jnp.allclose(out, ref, atol=1e-5), "small-batch mismatch"

    # Larger batch exercising the grid (2 tiles) + ragged-batch padding.
    x2 = jax.random.normal(k_x2, (260, state_size), jnp.float32)
    out2 = jax.block_until_ready(actor_forward(x2, packed, num_actions))
    ref2 = _reference(x2, params)
    assert out2.shape == (260, num_actions)
    assert jnp.allclose(out2, ref2, atol=1e-5), "large-batch mismatch"

    print("KERNEL_OK")
</pallas_src>

<mosaic_0001>
module attributes {stable_mosaic.version = 11 : i64} {
  func.func @actor_kernel(%arg0: i32, %arg1: memref<8x8xf32, #tpu.memory_space<vmem>>, %arg2: memref<8x128xf32, #tpu.memory_space<vmem>>, %arg3: memref<1x128xf32, #tpu.memory_space<vmem>>, %arg4: memref<128x128xf32, #tpu.memory_space<vmem>>, %arg5: memref<1x128xf32, #tpu.memory_space<vmem>>, %arg6: memref<128x128xf32, #tpu.memory_space<vmem>>, %arg7: memref<1x128xf32, #tpu.memory_space<vmem>>, %arg8: memref<8x128xf32, #tpu.memory_space<vmem>>) attributes {dimension_semantics = [#tpu.dimension_semantics<parallel>], iteration_bounds = array<i64: 1>, scalar_prefetch = 0 : i64, scratch_operands = 0 : i64, tpu.core_type = #tpu.core_type<tc>, window_params = [{transform_indices = @transform_0, window_bounds = array<i64: 8, 8>}, {pipeline_mode = #tpu.pipeline_mode<synchronous>, transform_indices = @transform_1, window_bounds = array<i64: 8, 128>}, {pipeline_mode = #tpu.pipeline_mode<synchronous>, transform_indices = @transform_2, window_bounds = array<i64: 1, 128>}, {pipeline_mode = #tpu.pipeline_mode<synchronous>, transform_indices = @transform_3, window_bounds = array<i64: 128, 128>}, {pipeline_mode = #tpu.pipeline_mode<synchronous>, transform_indices = @transform_4, window_bounds = array<i64: 1, 128>}, {pipeline_mode = #tpu.pipeline_mode<synchronous>, transform_indices = @transform_5, window_bounds = array<i64: 128, 128>}, {pipeline_mode = #tpu.pipeline_mode<synchronous>, transform_indices = @transform_6, window_bounds = array<i64: 1, 128>}, {transform_indices = @transform_7, window_bounds = array<i64: 8, 128>}]} {
    %c0 = arith.constant 0 : index
    %c0_0 = arith.constant 0 : index
    %0 = vector.load %arg1[%c0, %c0_0] : memref<8x8xf32, #tpu.memory_space<vmem>>, vector<8x8xf32>
    %c0_1 = arith.constant 0 : index
    %c0_2 = arith.constant 0 : index
    %1 = vector.load %arg2[%c0_1, %c0_2] : memref<8x128xf32, #tpu.memory_space<vmem>>, vector<8x128xf32>
    %cst = arith.constant dense<0.000000e+00> : vector<8x128xf32>
    %2 = tpu.matmul %0, %1, %cst {dimension_numbers = #tpu.dot_dimension_numbers<[1], [0], [0], [1], [0, 0, 1, 1], [], []>} : vector<8x8xf32>, vector<8x128xf32>, vector<8x128xf32> -> vector<8x128xf32>
    %c0_3 = arith.constant 0 : index
    %c0_4 = arith.constant 0 : index
    %3 = vector.load %arg3[%c0_3, %c0_4] : memref<1x128xf32, #tpu.memory_space<vmem>>, vector<1x128xf32>
    %4 = vector.broadcast %3 : vector<1x128xf32> to vector<8x128xf32>
    %5 = arith.addf %2, %4 : vector<8x128xf32>
    %cst_5 = arith.constant 0.000000e+00 : f32
    %6 = vector.broadcast %cst_5 : f32 to vector<8x128xf32>
    %7 = arith.maximumf %5, %6 : vector<8x128xf32>
    %c0_6 = arith.constant 0 : index
    %c0_7 = arith.constant 0 : index
    %8 = vector.load %arg4[%c0_6, %c0_7] : memref<128x128xf32, #tpu.memory_space<vmem>>, vector<128x128xf32>
    %cst_8 = arith.constant dense<0.000000e+00> : vector<8x128xf32>
    %9 = tpu.matmul %7, %8, %cst_8 {dimension_numbers = #tpu.dot_dimension_numbers<[1], [0], [0], [1], [0, 0, 1, 1], [], []>} : vector<8x128xf32>, vector<128x128xf32>, vector<8x128xf32> -> vector<8x128xf32>
    %c0_9 = arith.constant 0 : index
    %c0_10 = arith.constant 0 : index
    %10 = vector.load %arg5[%c0_9, %c0_10] : memref<1x128xf32, #tpu.memory_space<vmem>>, vector<1x128xf32>
    %11 = vector.broadcast %10 : vector<1x128xf32> to vector<8x128xf32>
    %12 = arith.addf %9, %11 : vector<8x128xf32>
    %cst_11 = arith.constant 0.000000e+00 : f32
    %13 = vector.broadcast %cst_11 : f32 to vector<8x128xf32>
    %14 = arith.maximumf %12, %13 : vector<8x128xf32>
    %c0_12 = arith.constant 0 : index
    %c0_13 = arith.constant 0 : index
    %15 = vector.load %arg6[%c0_12, %c0_13] : memref<128x128xf32, #tpu.memory_space<vmem>>, vector<128x128xf32>
    %cst_14 = arith.constant dense<0.000000e+00> : vector<8x128xf32>
    %16 = tpu.matmul %14, %15, %cst_14 {dimension_numbers = #tpu.dot_dimension_numbers<[1], [0], [0], [1], [0, 0, 1, 1], [], []>} : vector<8x128xf32>, vector<128x128xf32>, vector<8x128xf32> -> vector<8x128xf32>
    %c0_15 = arith.constant 0 : index
    %c0_16 = arith.constant 0 : index
    %17 = vector.load %arg7[%c0_15, %c0_16] : memref<1x128xf32, #tpu.memory_space<vmem>>, vector<1x128xf32>
    %18 = vector.broadcast %17 : vector<1x128xf32> to vector<8x128xf32>
    %19 = arith.addf %16, %18 : vector<8x128xf32>
    %20 = arith.negf %19 : vector<8x128xf32>
    %21 = math.exp %20 : vector<8x128xf32>
    %cst_17 = arith.constant 1.000000e+00 : f32
    %22 = vector.broadcast %cst_17 : f32 to vector<8x128xf32>
    %23 = arith.addf %22, %21 : vector<8x128xf32>
    %24 = arith.divf %22, %23 : vector<8x128xf32>
    %cst_18 = arith.constant 0.000000e+00 : f32
    %25 = vector.broadcast %cst_18 : f32 to vector<8x128xf32>
    %26 = arith.mulf %24, %25 : vector<8x128xf32>
    %cst_19 = arith.constant 1.000000e+00 : f32
    %27 = vector.broadcast %cst_19 : f32 to vector<8x128xf32>
    %28 = arith.addf %26, %27 : vector<8x128xf32>
    %c0_20 = arith.constant 0 : index
    %c0_21 = arith.constant 0 : index
    %29 = vector.load %arg8[%c0_20, %c0_21] : memref<8x128xf32, #tpu.memory_space<vmem>>, vector<8x128xf32>
    tpu.vector_store %arg8[%c0_20, %c0_21], %28 {strides = array<i32>} : memref<8x128xf32, #tpu.memory_space<vmem>>, vector<8x128xf32>,
    return
  }
  func.func @transform_0(%arg0: i32) -> (i32, i32) {
    %c0_i32 = arith.constant 0 : i32
    %c0_i32_0 = arith.constant 0 : i32
    return %arg0, %c0_i32 : i32, i32
  }
  func.func @transform_1(%arg0: i32) -> (i32, i32) {
    %c0_i32 = arith.constant 0 : i32
    %c0_i32_0 = arith.constant 0 : i32
    %c0_i32_1 = arith.constant 0 : i32
    return %c0_i32, %c0_i32_0 : i32, i32
  }
  func.func @transform_2(%arg0: i32) -> (i32, i32) {
    %c0_i32 = arith.constant 0 : i32
    %c0_i32_0 = arith.constant 0 : i32
    %c0_i32_1 = arith.constant 0 : i32
    return %c0_i32, %c0_i32_0 : i32, i32
  }
  func.func @transform_3(%arg0: i32) -> (i32, i32) {
    %c0_i32 = arith.constant 0 : i32
    %c0_i32_0 = arith.constant 0 : i32
    %c0_i32_1 = arith.constant 0 : i32
    return %c0_i32, %c0_i32_0 : i32, i32
  }
  func.func @transform_4(%arg0: i32) -> (i32, i32) {
    %c0_i32 = arith.constant 0 : i32
    %c0_i32_0 = arith.constant 0 : i32
    %c0_i32_1 = arith.constant 0 : i32
    return %c0_i32, %c0_i32_0 : i32, i32
  }
  func.func @transform_5(%arg0: i32) -> (i32, i32) {
    %c0_i32 = arith.constant 0 : i32
    %c0_i32_0 = arith.constant 0 : i32
    %c0_i32_1 = arith.constant 0 : i32
    return %c0_i32, %c0_i32_0 : i32, i32
  }
  func.func @transform_6(%arg0: i32) -> (i32, i32) {
    %c0_i32 = arith.constant 0 : i32
    %c0_i32_0 = arith.constant 0 : i32
    %c0_i32_1 = arith.constant 0 : i32
    return %c0_i32, %c0_i32_0 : i32, i32
  }
  func.func @transform_7(%arg0: i32) -> (i32, i32) {
    %c0_i32 = arith.constant 0 : i32
    %c0_i32_0 = arith.constant 0 : i32
    return %arg0, %c0_i32 : i32, i32
  }
}

</mosaic_0001>

<bundles_post_ra>
// kernel: tpu_custom_call.1
= control target key start
LH: loop header
LB: loop body
LE: loop exit
PB: predicated region body
PF: predicated region fallthrough
CT: control target
= control target key end

     0   :  { %12 = vsyncpa [#allocation3], 0  ;;  %s809_s0 = inlined_call_operand.hbm [shape: f32[8,8], index: 0, kind: input, shape index: {}]   ;;  %s810_s1 = inlined_call_operand.hbm [shape: f32[8,128], index: 1, kind: input, shape index: {}]   ;;  %s811_s2 = inlined_call_operand.vmem [shape: f32[1,128], index: 2, kind: input, shape index: {}]   ;;  %s812_s3 = inlined_call_operand.hbm [shape: f32[128,128], index: 3, kind: input, shape index: {}]   ;;  %s813_s4 = inlined_call_operand.vmem [shape: f32[1,128], index: 4, kind: input, shape index: {}]   ;;  %s814_s5 = inlined_call_operand.hbm [shape: f32[128,128], index: 5, kind: input, shape index: {}]   ;;  %s815_s6 = inlined_call_operand.vmem [shape: f32[1,128], index: 6, kind: input, shape index: {}]   ;;  %s816_s7 = inlined_call_operand.hbm [shape: f32[8,128], index: 7, kind: output, shape index: {}]  }
   0x1   :  { %13 = vsyncpa [#allocation6], 0 }
   0x2   :  { %14 = vsyncpa [#allocation9], 0 }
   0x3   :  { %15 = vsyncpa [#allocation4], 0  ;;  %s671_s24 = smov [#allocation5]   ;;  %s672_s26 = smov [#allocation2]  }
   0x4   :  { %s32_s25 = sshll.u32 %s671_s24, 4  ;;  %s22_s27 = sshll.u32 %s672_s26, 4  ;;  %s33_s25 = int_to_ptr.vmem [resolvable:$true] %s32_s25  ;;  %s23_s27 = int_to_ptr.vmem [resolvable:$true] %s22_s27 }
   0x5   :  { %s553_s30 = scalar_lea.hbm %s810_s1, 128 }
   0x6   :  { %p554_p0 = scmp.ne.s32.totalorder %s810_s1, %s553_s30  ;;  %p557_p1 = scmp.lt.u32.totalorder %s553_s30, %s810_s1 }
   0x8   :  { %p559_p2 = pnand %p557_p1, %p554_p0 }
   0xa   :  { %562 = shalt.err (!%p559_p2)
}
   0xb   :  { %s563_s12 = scalar_lea.vmem %s33_s25, 128  ;;  %p568_p4 = scmp.lt.s32.totalorder %s33_s25, %s33_s25 }
   0xc   :  { %p564_p3 = scmp.ne.s32.totalorder %s33_s25, %s563_s12  ;;  %p569_p5 = scmp.lt.s32.totalorder %s563_s12, %s563_s12 }
   0xe   :  { %p570_p6 = por %p569_p5, %p568_p4 }
  0x10   :  { %p571_p7 = pnand %p570_p6, %p564_p3 }
  0x12   :  { %574 = shalt.err (!%p571_p7)
}
  0x13   :  { %35 = dma.hbm_to_vmem [thread:$0]  %s810_s1, 128, %s33_s25, [#allocation6]  }
  0x14   :  { %s575_s17 = scalar_lea.hbm %s809_s0, 128 }
  0x15   :  { %p576_p8 = scmp.ne.s32.totalorder %s809_s0, %s575_s17  ;;  %p579_p9 = scmp.lt.u32.totalorder %s575_s17, %s809_s0 }
  0x17   :  { %p581_p10 = pnand %p579_p9, %p576_p8 }
  0x19   :  { %584 = shalt.err (!%p581_p10)
}
  0x1a   :  { %s585_s22 = scalar_lea.vmem %s23_s27, 128  ;;  %p590_p12 = scmp.lt.s32.totalorder %s23_s27, %s23_s27 }
  0x1b   :  { %p586_p11 = scmp.ne.s32.totalorder %s23_s27, %s585_s22  ;;  %p591_p13 = scmp.lt.s32.totalorder %s585_s22, %s585_s22 }
  0x1d   :  { %p592_p0 = por %p591_p13, %p590_p12 }
  0x1f   :  { %p593_p1 = pnand %p592_p0, %p586_p11 }
  0x21   :  { %596 = shalt.err (!%p593_p1)
}
  0x22   :  { %25 = dma.hbm_to_vmem [thread:$0]  %s809_s0, 128, %s23_s27, [#allocation3]  }
  0x23   :  { %s673_s24 = smov [#allocation7]   ;;  %s597_s29 = scalar_lea.hbm %s812_s3, 2048 }
  0x24   :  { %s43_s25 = sshll.u32 %s673_s24, 4  ;;  %p598_p2 = scmp.ne.s32.totalorder %s812_s3, %s597_s29  ;;  %s44_s25 = int_to_ptr.vmem [resolvable:$true] %s43_s25 }
  0x25   :  { %p601_p3 = scmp.lt.u32.totalorder %s597_s29, %s812_s3 }
  0x27   :  { %p603_p4 = pnand %p601_p3, %p598_p2 }
  0x29   :  { %606 = shalt.err (!%p603_p4)
}
  0x2a   :  { %s607_s11 = scalar_lea.vmem %s44_s25, 2048  ;;  %p612_p6 = scmp.lt.s32.totalorder %s44_s25, %s44_s25 }
  0x2b   :  { %p608_p5 = scmp.ne.s32.totalorder %s44_s25, %s607_s11  ;;  %p613_p7 = scmp.lt.s32.totalorder %s607_s11, %s607_s11 }
  0x2d   :  { %p614_p8 = por %p613_p7, %p612_p6 }
  0x2f   :  { %p615_p9 = pnand %p614_p8, %p608_p5 }
  0x31   :  { %618 = shalt.err (!%p615_p9)
}
  0x32   :  { %s674_s0 = smov 128   ;;  %s675_s27 = smov 8  }
  0x33   :  { %49 = dma.hbm_to_vmem [thread:$0]  %s812_s3, 2048, %s44_s25, [#allocation6], %s674_s0, %s674_s0, %s675_s27  }
  0x34   :  { %s676_s14 = smov [#allocation8]   ;;  %s619_s18 = scalar_lea.hbm %s814_s5, 2048 }
  0x35   :  { %s57_s15 = sshll.u32 %s676_s14, 4  ;;  %p620_p10 = scmp.ne.s32.totalorder %s814_s5, %s619_s18  ;;  %s58_s15 = int_to_ptr.vmem [resolvable:$true] %s57_s15 }
  0x36   :  { %p623_p11 = scmp.lt.u32.totalorder %s619_s18, %s814_s5 }
  0x38   :  { %p625_p12 = pnand %p623_p11, %p620_p10 }
  0x3a   :  { %628 = shalt.err (!%p625_p12)
}
  0x3b   :  { %s629_s1 = scalar_lea.vmem %s58_s15, 2048  ;;  %p634_p0 = scmp.lt.s32.totalorder %s58_s15, %s58_s15 }
  0x3c   :  { %p630_p13 = scmp.ne.s32.totalorder %s58_s15, %s629_s1  ;;  %p635_p1 = scmp.lt.s32.totalorder %s629_s1, %s629_s1 }
  0x3e   :  { %p636_p2 = por %p635_p1, %p634_p0 }
  0x40   :  { %p637_p3 = pnand %p636_p2, %p630_p13 }
  0x42   :  { %640 = shalt.err (!%p637_p3)
}
  0x43   :  { %63 = dma.hbm_to_vmem [thread:$0]  %s814_s5, 2048, %s58_s15, [#allocation9], %s674_s0, %s674_s0, %s675_s27  }
  0x44   :  { %663 = dma.done.wait [#allocation3], 128  }
  0x45   :  { %664 = vsyncadd [#allocation3], 4294967168 }
  0x46   :  { %665 = dma.done.wait [#allocation6], 2176  }
  0x47   :  { %666 = vsyncadd [#allocation6], 4294965120 }
  0x48   :  { %667 = dma.done.wait [#allocation9], 2048  }
  0x49   :  { %668 = vsyncadd [#allocation9], 4294965248  ;;  %v677_v0 = vmov 0.0   ;;  %vm678_vm0 = vmmov 0   ;;  %v679_v1 = vmov 0.0|0.0   ;;  %vm87_vm1 = vcmask 64512  }
  0x4a   :  { %416 = vmatprep.subr.mxu0 %v677_v0  ;;  %418 = vmatprep.mubr.msk.f32.mxu0 %vm678_vm0, %v677_v0  ;;  %v79_v2 = vld [vmem:[#allocation5] sm:$0xff]  ;;  %v78_v3 = vld [vmem:[#allocation2] sm:$0xff]  ;;  %v162_v4 = vld [vmem:[#allocation7] sm:$0xff]  ;;  %s680_s29 = smov [#allocation10]  }
  0x4b   :  { %491 = vmatprep.subr.bf16.mxu1 %v679_v1  ;;  %453 = vmatprep.mubr.msk.f32.mxu1 %vm678_vm0, %v677_v0  ;;  %v163_v5 = vld [vmem:[#allocation7 + $0x8] sm:$0xff]  ;;  %v164_v6 = vld [vmem:[#allocation7 + $0x10] sm:$0xff]  ;;  %v165_v7 = vld [vmem:[#allocation7 + $0x18] sm:$0xff] }
  0x4c   :  { %417 = vmatpush3.msra.mxu0 %v79_v2  ;;  %v492_v8 = vpack.c.bf16 %v163_v5, %v162_v4  ;;  %v495_v9 = vpack.c.bf16 %v165_v7, %v164_v6  ;;  %v166_v10 = vld [vmem:[#allocation7 + $0x20] sm:$0xff]  ;;  %v167_v11 = vld [vmem:[#allocation7 + $0x28] sm:$0xff]  ;;  %v168_v13 = vld [vmem:[#allocation7 + $0x30] sm:$0xff] }
  0x4d   :  { %419 = vmatmul.mubr.msk.f32.vlgmr.msra.gmra.mrb[0].mxu0 %vm87_vm1, %v78_v3  ;;  %515 = vmatprep.subr.bf16.mxu0 %v679_v1  ;;  %v498_v12 = vpack.c.bf16 %v167_v11, %v166_v10  ;;  %v169_v14 = vld [vmem:[#allocation7 + $0x38] sm:$0xff]  ;;  %v170_v16 = vld [vmem:[#allocation7 + $0x40] sm:$0xff]  ;;  %v171_v17 = vld [vmem:[#allocation7 + $0x48] sm:$0xff] }
  0x4e   :  { %488 = vmatprep.mubr.msk.f32.mxu0 %vm678_vm0, %v677_v0  ;;  %493 = vmatpush3.bf16.msra.mxu1 %v492_v8  ;;  %v501_v15 = vpack.c.bf16 %v169_v14, %v168_v13  ;;  %v504_v18 = vpack.c.bf16 %v171_v17, %v170_v16  ;;  %v172_v19 = vld [vmem:[#allocation7 + $0x50] sm:$0xff]  ;;  %v173_v20 = vld [vmem:[#allocation7 + $0x58] sm:$0xff]  ;;  %v174_v22 = vld [vmem:[#allocation7 + $0x60] sm:$0xff] }
  0x4f   :  { %494 = vmatprep.subr.bf16.mxu1 %v679_v1  ;;  %v507_v21 = vpack.c.bf16 %v173_v20, %v172_v19  ;;  %v175_v23 = vld [vmem:[#allocation7 + $0x68] sm:$0xff]  ;;  %v176_v25 = vld [vmem:[#allocation7 + $0x70] sm:$0xff]  ;;  %v177_v26 = vld [vmem:[#allocation7 + $0x78] sm:$0xff] }
  0x50   :  { %v510_v24 = vpack.c.bf16 %v175_v23, %v174_v22  ;;  %v513_v27 = vpack.c.bf16 %v177_v26, %v176_v25  ;;  %v256_v28 = vld [vmem:[#allocation8] sm:$0xff]  ;;  %v257_v29 = vld [vmem:[#allocation8 + $0x8] sm:$0xff]  ;;  %v258_v30 = vld [vmem:[#allocation8 + $0x10] sm:$0xff] }
  0x51   :  { %v516_v31 = vpack.c.bf16 %v257_v29, %v256_v28  ;;  %v259_v32 = vld [vmem:[#allocation8 + $0x18] sm:$0xff]  ;;  %v260_v34 = vld [vmem:[#allocation8 + $0x20] sm:$0xff]  ;;  %v261_v35 = vld [vmem:[#allocation8 + $0x28] sm:$0xff] }
  0x52   :  { %496 = vmatpush3.bf16.msra.mxu1 %v495_v9  ;;  %v519_v33 = vpack.c.bf16 %v259_v32, %v258_v30  ;;  %v522_v36 = vpack.c.bf16 %v261_v35, %v260_v34  ;;  %v262_v37 = vld [vmem:[#allocation8 + $0x30] sm:$0xff]  ;;  %v263_v38 = vld [vmem:[#allocation8 + $0x38] sm:$0xff]  ;;  %v264_v40 = vld [vmem:[#allocation8 + $0x40] sm:$0xff] }
  0x53   :  { %497 = vmatprep.subr.bf16.mxu1 %v679_v1  ;;  %517 = vmatpush3.bf16.msra.mxu0 %v516_v31  ;;  %v525_v39 = vpack.c.bf16 %v263_v38, %v262_v37  ;;  %v265_v41 = vld [vmem:[#allocation8 + $0x48] sm:$0xff]  ;;  %v266_v43 = vld [vmem:[#allocation8 + $0x50] sm:$0xff]  ;;  %v267_v44 = vld [vmem:[#allocation8 + $0x58] sm:$0xff] }
  0x54   :  { %518 = vmatprep.subr.bf16.mxu0 %v679_v1  ;;  %v528_v42 = vpack.c.bf16 %v265_v41, %v264_v40  ;;  %v531_v45 = vpack.c.bf16 %v267_v44, %v266_v43  ;;  %v268_v46 = vld [vmem:[#allocation8 + $0x60] sm:$0xff]  ;;  %v269_v47 = vld [vmem:[#allocation8 + $0x68] sm:$0xff]  ;;  %v375_v49 = vld [vmem:[%s811_s2] ss:$0 sm:$0xff] }
  0x55   :  { %v534_v48 = vpack.c.bf16 %v269_v47, %v268_v46  ;;  %v270_v54 = vld [vmem:[#allocation8 + $0x70] sm:$0xff]  ;;  %v271_v55 = vld [vmem:[#allocation8 + $0x78] sm:$0xff] }
  0x56   :  { %499 = vmatpush3.bf16.msra.mxu1 %v498_v12  ;;  %v537_v56 = vpack.c.bf16 %v271_v55, %v270_v54  ;;  %v377_v57 = vld [vmem:[%s813_s4] ss:$0 sm:$0xff]  ;;  %s364_s4 = sshll.u32 %s680_s29, 4  ;;  %s365_s4 = int_to_ptr.vmem [resolvable:$true] %s364_s4 }
  0x57   :  { %500 = vmatprep.subr.bf16.mxu1 %v679_v1  ;;  %520 = vmatpush3.bf16.msra.mxu0 %v519_v33  ;;  %v378_v62 = vld [vmem:[%s815_s6] ss:$0 sm:$0xff]  ;;  %s641_s30 = scalar_lea.vmem %s365_s4, 128  ;;  %p646_p5 = scmp.lt.s32.totalorder %s365_s4, %s365_s4 }
  0x58   :  { %521 = vmatprep.subr.bf16.mxu0 %v679_v1  ;;  %p642_p4 = scmp.ne.s32.totalorder %s365_s4, %s641_s30  ;;  %p647_p6 = scmp.lt.s32.totalorder %s641_s30, %s641_s30 }
  0x5a   :  { %502 = vmatpush3.bf16.msra.mxu1 %v501_v15  ;;  %p648_p7 = por %p647_p6, %p646_p5 }
  0x5b   :  { %503 = vmatprep.subr.bf16.mxu1 %v679_v1  ;;  %523 = vmatpush3.bf16.msra.mxu0 %v522_v36 }
  0x5c   :  { %524 = vmatprep.subr.bf16.mxu0 %v679_v1  ;;  %p649_p8 = pnand %p648_p7, %p642_p4 }
  0x5e   :  { %505 = vmatpush3.bf16.msra.mxu1 %v504_v18 }
  0x5f   :  { %506 = vmatprep.subr.bf16.mxu1 %v679_v1  ;;  %526 = vmatpush3.bf16.msra.mxu0 %v525_v39 }
  0x60   :  { %527 = vmatprep.subr.bf16.mxu0 %v679_v1 }
  0x62   :  { %508 = vmatpush3.bf16.msra.mxu1 %v507_v21 }
  0x63   :  { %509 = vmatprep.subr.bf16.mxu1 %v679_v1  ;;  %529 = vmatpush3.bf16.msra.mxu0 %v528_v42 }
  0x64   :  { %530 = vmatprep.subr.bf16.mxu0 %v679_v1 }
  0x66   :  { %511 = vmatpush3.bf16.msra.mxu1 %v510_v24 }
  0x67   :  { %512 = vmatprep.subr.bf16.mxu1 %v679_v1  ;;  %532 = vmatpush3.bf16.msra.mxu0 %v531_v45 }
  0x68   :  { %533 = vmatprep.subr.bf16.mxu0 %v679_v1 }
  0x6a   :  { %514 = vmatpush3.bf16.msra.mxu1 %v513_v27 }
  0x6b   :  { %535 = vmatpush3.bf16.msra.mxu0 %v534_v48 }
  0x6c   :  { %536 = vmatprep.subr.bf16.mxu0 %v679_v1 }
  0x6f   :  { %538 = vmatpush3.bf16.msra.mxu0 %v537_v56 }
 0x120   :  { %v157_v50 = vpop.f32.mrb[0].mxu0 }
 0x121   :  { %v158_v51 = vadd.f32 %v375_v49, %v157_v50  ;;  %v420_v52 = vpop.f32.mrb[1].mxu0 }
 0x123   :  { %v161_v53 = vmax.f32 %v158_v51, 0.0 }
 0x125   :  { %454 = vmatmul.mubr.f32.vlgmr.msra.gmra.mrb[0].mxu1 %v161_v53 }
 0x1f8   :  { %v251_v58 = vpop.f32.mrb[0].mxu1 }
 0x1f9   :  { %v252_v59 = vadd.f32 %v377_v57, %v251_v58  ;;  %v455_v60 = vpop.f32.mrb[1].mxu1 }
 0x1fb   :  { %v255_v61 = vmax.f32 %v252_v59, 0.0 }
 0x1fd   :  { %489 = vmatmul.mubr.f32.vlgmr.msra.gmra.mrb[2].mxu0 %v255_v61 }
 0x2d0   :  { %v345_v63 = vpop.f32.mrb[2].mxu0 }
 0x2d1   :  { %v346_v0 = vadd.f32 %v378_v62, %v345_v63  ;;  %v490_v1 = vpop.f32.mrb[3].mxu0 }
 0x2d3   :  { %v379_v2 = vmul.f32 -1.442695, %v346_v0 }
 0x2d5   :  { %549 = vpow2.f32 %v379_v2 }
 0x2df   :  { %v550_v3 = vpop.eup %549 }
 0x2e0   :  { %v352_v4 = vadd.f32 1.0, %v550_v3 }
 0x2e2   :  { %551 = vrcp.f32 %v352_v4 }
 0x2ec   :  { %v552_v5 = vpop.eup %551 }
 0x2ed   :  { %v355_v6 = vmul.f32 0.0, %v552_v5 }
 0x2ef   :  { %v356_v7 = vadd.f32 1.0, %v355_v6 }
 0x2f1   :  { %357 = vst [vmem:[#allocation10] sm:$0xff] %v356_v7 }
 0x2f2   :  { %652 = shalt.err (!%p649_p8)
}
 0x2f3   :  { %s653_s9 = scalar_lea.hbm %s816_s7, 128 }
 0x2f4   :  { %p654_p9 = scmp.ne.s32.totalorder %s816_s7, %s653_s9  ;;  %p657_p10 = scmp.lt.u32.totalorder %s653_s9, %s816_s7 }
 0x2f6   :  { %p659_p11 = pnand %p657_p10, %p654_p9 }
 0x2f8   :  { %662 = shalt.err (!%p659_p11)
}
 0x2f9   :  { %367 = dma.vmem_to_hbm [thread:$0]  %s365_s4, 128, %s816_s7, [#allocation4]  }
 0x2fa   :  { %669 = dma.done.wait [#allocation4], 128  }
 0x2fb   :  { %670 = vsyncadd [#allocation4], 4294967168 }
 0x2fc   :  { %371 = vsyncpa [#allocation3], 1 }
 0x2fd   :  { %372 = vsyncpa [#allocation6], 1 }
 0x2fe   :  { %373 = vsyncpa [#allocation9], 1 }
 0x2ff   :  { %374 = vsyncpa [#allocation4], 1 }

</bundles_post_ra>
